<compile_context>
chip_gen: v5e
topology: v5e:2x2
jax: 0.10.0
libtpu: 0.0.40
codegen_flags: <defaults>
</compile_context>

<pallas_src>
import functools

import jax
import jax.numpy as jnp
from jax.experimental import pallas as pl
from jax.experimental.pallas import tpu as pltpu


_SUBLANES = 8            # rows per sample in packed layout (fills vreg sublanes)
_LANES = 128
# ~1 MiB f32 block per stream per step (8 x 32768 x 4B).  Sized against the
# 32 MiB scoped-VMEM limit so it is safe on v7x (64 MiB physical) as well as
# v5e/v6e (128 MiB).
_MAX_TILE_LANES = 32768
_VMEM_LIMIT_BYTES = 32 * 1024 * 1024


def _round_up(x, m):
    return (x + m - 1) // m * m


def _tiling(d, max_tile_lanes=_MAX_TILE_LANES):
    """Static tiling plan for true flat size d: (d_pad, dp, tile, num_tiles).

    Padding waste is bounded: dp is rounded up per-tile (<=128*num_tiles extra
    lanes per row), not up to a whole max-width tile.
    """
    assert max_tile_lanes % _LANES == 0
    dp_min = _round_up(-(-d // _SUBLANES), _LANES)          # min lanes per packed row
    num_tiles = -(-dp_min // max_tile_lanes)                # ceil
    tile = _round_up(-(-dp_min // num_tiles), _LANES)
    dp = tile * num_tiles
    return dp * _SUBLANES, dp, tile, num_tiles


def _pack(x_flat, d_pad):
    """(B, D) -> (B*8, d_pad//8), zero padded along D (padding is masked in-kernel)."""
    b, d = x_flat.shape
    if d_pad != d:
        x_flat = jnp.pad(x_flat, ((0, 0), (0, d_pad - d)))
    return x_flat.reshape(b * _SUBLANES, d_pad // _SUBLANES)


# ----------------------------- Pallas kernels -----------------------------

def _net_input_kernel(scal_ref, x_ref, noise_ref, netin_ref):
    """net_in = c_in*x + (c_in*sigma)*noise  (== c_in * (x + sigma*noise))."""
    b = pl.program_id(0)
    c_in = scal_ref[0, b]           # SMEM scalar reads, f32
    c_in_sigma = scal_ref[1, b]
    x = x_ref[...].astype(jnp.float32)
    noise = noise_ref[...].astype(jnp.float32)
    netin_ref[...] = (c_in * x + c_in_sigma * noise).astype(netin_ref.dtype)


def _lane_fold_add(acc, v):
    """acc(8,128) += lane-folded sum of v(8,L) using VPU adds only.

    Repeatedly folds the tile in half (peeling one 128-lane chunk when the
    chunk count is odd) so the per-step work is plain vector adds with log
    depth; the only XLU cross-lane reduce happens once at finalize.
    """
    lanes = v.shape[-1]
    while lanes > _LANES:
        if (lanes // _LANES) % 2 == 1:
            acc = acc + v[:, lanes - _LANES:lanes]
            lanes -= _LANES
        half = lanes // 2
        v = v[:, :half] + v[:, half:lanes]
        lanes = half
    return acc + v


def _fused_loss_kernel(scal_ref, target_ref, noise_ref, netout_ref,
                       out_ref, acc_ref, *, loss_type, tile, dp, true_d,
                       need_mask):
    """pred = c_skip*(x+sigma*noise) + c_out*net_out; per-sample weighted mean.

    NOTE: the D-tile axis MUST remain the LAST grid axis and be marked
    "arbitrary" -- the t==0 init / t==last finalize accumulator pattern
    depends on it.
    """
    t = pl.program_id(1)

    @pl.when(t == 0)
    def _():
        acc_ref[...] = jnp.zeros_like(acc_ref)

    b = pl.program_id(0)
    a_x = scal_ref[0, b]            # c_skip - 1
    a_noise = scal_ref[1, b]        # c_skip * sigma
    a_net = scal_ref[2, b]          # c_out

    target = target_ref[...].astype(jnp.float32)
    noise = noise_ref[...].astype(jnp.float32)
    net_out = netout_ref[...].astype(jnp.float32)

    # pred - target = c_skip*(x + sigma*noise) + c_out*net_out - x
    diff = a_x * target + a_noise * noise + a_net * net_out
    if loss_type == "l2":
        err = diff * diff
    else:  # "l1"
        err = jnp.abs(diff)

    if need_mask:
        # Packed (row s, lane j) of tile t holds flat index s*dp + t*tile + j;
        # valid iff < true_d.  Guards against the external network writing
        # nonzero values (biases, etc.) into the zero-padded region.
        lane = jax.lax.broadcasted_iota(jnp.int32, err.shape, 1) + t * tile
        row = jax.lax.broadcasted_iota(jnp.int32, err.shape, 0)
        err = jnp.where(lane < true_d - row * dp, err, 0.0)

    # VPU-only accumulate into the persistent (8, 128) f32 scratch.
    acc_ref[...] = _lane_fold_add(acc_ref[...], err)

    @pl.when(t == pl.num_programs(1) - 1)
    def _():
        w_inv_d = scal_ref[3, b]                 # loss_weight / true_d (hoisted)
        total = jnp.sum(acc_ref[...]) * w_inv_d  # single XLU reduce per sample
        out_ref[...] = jnp.full(out_ref.shape, total, dtype=out_ref.dtype)


# ----------------------------- kernel wrappers -----------------------------

def pallas_net_input(x_packed, noise_packed, c_in, c_in_sigma,
                     tile, num_tiles, out_dtype=None):
    """Returns net_in_packed (B*8, Dp) = c_in * (x + sigma*noise)."""
    br, dp = x_packed.shape
    b = br // _SUBLANES
    out_dtype = out_dtype if out_dtype is not None else x_packed.dtype
    scal = jnp.stack([c_in, c_in_sigma]).astype(jnp.float32)      # (2, B) -> SMEM
    data_spec = pl.BlockSpec((_SUBLANES, tile), lambda i, t: (i, t))
    return pl.pallas_call(
        _net_input_kernel,
        out_shape=jax.ShapeDtypeStruct((br, dp), out_dtype),
        grid_spec=pltpu.PrefetchScalarGridSpec(
            num_scalar_prefetch=0,
            grid=(b, num_tiles),
            in_specs=[
                pl.BlockSpec(memory_space=pltpu.MemorySpace.SMEM),
                data_spec,
                data_spec,
            ],
            out_specs=data_spec,
        ),
        compiler_params=pltpu.CompilerParams(
            dimension_semantics=("parallel", "parallel"),
            vmem_limit_bytes=_VMEM_LIMIT_BYTES),
    )(scal, x_packed, noise_packed)


def pallas_fused_edm_loss(x_packed, noise_packed, netout_packed,
                          sigmas, c_skip, c_out, w, loss_type, true_d,
                          dp, tile, num_tiles):
    """Per-sample loss (B,) = mean_D( w * (c_skip*(x+sigma*noise)+c_out*net_out - x)^p )."""
    br, _ = x_packed.shape
    b = br // _SUBLANES
    scal = jnp.stack([c_skip - 1.0,
                      c_skip * sigmas,
                      c_out,
                      w / float(true_d)]).astype(jnp.float32)     # (4, B) -> SMEM
    data_spec = pl.BlockSpec((_SUBLANES, tile), lambda i, t: (i, t))
    # TODO(synk): if xprof shows exposed inbound DMA here, sweep
    #   pipeline_mode=pl.Buffered(3) on data_spec (watch v7x VMEM headroom).
    kernel = functools.partial(
        _fused_loss_kernel, loss_type=loss_type, tile=tile, dp=dp,
        true_d=true_d, need_mask=(dp * _SUBLANES != true_d))
    out = pl.pallas_call(
        kernel,
        # lane-dense (8,128) output slab, written once per sample at finalize
        out_shape=jax.ShapeDtypeStruct((br, _LANES), jnp.float32),
        grid_spec=pltpu.PrefetchScalarGridSpec(
            num_scalar_prefetch=0,
            grid=(b, num_tiles),      # reduction (D-tile) axis is LAST
            in_specs=[
                pl.BlockSpec(memory_space=pltpu.MemorySpace.SMEM),
                data_spec,   # target (x)
                data_spec,   # noise
                data_spec,   # net_out
            ],
            out_specs=pl.BlockSpec((_SUBLANES, _LANES), lambda i, t: (i, 0)),
            scratch_shapes=[pltpu.VMEM((_SUBLANES, _LANES), jnp.float32)],
        ),
        compiler_params=pltpu.CompilerParams(
            # D-tile axis must stay "arbitrary" (accumulator across it).
            dimension_semantics=("parallel", "arbitrary"),
            vmem_limit_bytes=_VMEM_LIMIT_BYTES),
    )(scal, x_packed, noise_packed, netout_packed)
    return out.reshape(b, _SUBLANES, _LANES)[:, 0, 0]


# ------------------------- Module re-implementation ------------------------

class StandardDiffusionLoss:
    def __init__(self,
                 p_mean: float = -1.2,       # sigma_sampler_config (EDM lognormal)
                 p_std: float = 1.2,
                 sigma_data: float = 1.0,    # loss_weighting_config (EDM)
                 loss_type: str = "l2",
                 use_additional_loss: bool = False,
                 offset_noise_level: float = 0.0,
                 additional_loss_weight: float = 0.0,
                 num_frames: int = 25,
                 max_tile_lanes: int = _MAX_TILE_LANES,
                 net_dtype=None):
        assert loss_type in ("l2", "l1")
        self.loss_type = loss_type
        self.use_additional_loss = use_additional_loss
        self.offset_noise_level = offset_noise_level
        self.additional_loss_weight = additional_loss_weight
        self.num_frames = num_frames
        self.p_mean = p_mean
        self.p_std = p_std
        self.sigma_data = sigma_data
        self.max_tile_lanes = max_tile_lanes
        self.net_dtype = net_dtype      # e.g. jnp.bfloat16 when the UNet runs bf16

    # ---- sigma_sampler (EDM lognormal sampling) ----
    def sigma_sampler(self, key, n):
        log_sigma = self.p_mean + self.p_std * jax.random.normal(key, (n,), jnp.float32)
        return jnp.exp(log_sigma)

    # ---- loss_weighting (EDM weighting) ----
    def loss_weighting(self, sigmas):
        sd = self.sigma_data
        return (sigmas ** 2 + sd ** 2) / (sigmas * sd) ** 2

    # ---- EDM denoiser preconditioners (scalar-per-sample glue math) ----
    def edm_preconditioners(self, sigmas):
        sd = self.sigma_data
        s2 = sigmas ** 2
        c_skip = sd ** 2 / (s2 + sd ** 2)
        c_out = sigmas * sd / jnp.sqrt(s2 + sd ** 2)
        c_in = 1.0 / jnp.sqrt(s2 + sd ** 2)
        c_noise = 0.25 * jnp.log(sigmas)
        return c_skip, c_out, c_in, c_noise

    def get_loss(self, x_packed, noise_packed, netout_packed, sigmas,
                 c_skip, c_out, w, true_d, dp, tile, num_tiles):
        if self.use_additional_loss:
            # TODO(synk): needs fourier_filter (FFT) + F.normalize; not kerneled.
            raise NotImplementedError(
                "use_additional_loss branch not kerneled (needs FFT).")
        return pallas_fused_edm_loss(x_packed, noise_packed, netout_packed,
                                     sigmas, c_skip, c_out, w, self.loss_type,
                                     true_d, dp, tile, num_tiles)

    def __call__(self, network, input_nchw, key):
        b, c, h, w_sp = input_nchw.shape
        d = c * h * w_sp
        d_pad, dp, tile, num_tiles = _tiling(d, self.max_tile_lanes)

        k_sigma, k_noise, k_offset = jax.random.split(key, 3)

        sigmas = self.sigma_sampler(k_sigma, b).astype(jnp.float32)      # (B,)
        cond_mask = jnp.zeros_like(sigmas)                               # (B,)
        noise = jax.random.normal(k_noise, input_nchw.shape, input_nchw.dtype)
        if self.offset_noise_level > 0.0:
            rand_init = jax.random.normal(k_offset, (b, c), input_nchw.dtype)
            noise = noise + self.offset_noise_level * rand_init[:, :, None, None]

        x_packed = _pack(input_nchw.reshape(b, d), d_pad)
        noise_packed = _pack(noise.reshape(b, d), d_pad)

        c_skip, c_out, c_in, c_noise = self.edm_preconditioners(sigmas)

        # kernel 1: net_in = c_in * (x + sigma*noise), one fused HBM pass.
        # The `noised` tensor itself is never materialized in HBM; kernel 2
        # re-derives it from x and noise (scalars folded in SMEM).
        net_in_packed = pallas_net_input(x_packed, noise_packed,
                                         c_in, c_in * sigmas, tile, num_tiles,
                                         out_dtype=self.net_dtype)

        # TODO(synk): real video UNet is external; stand-in operates on the
        # packed flat layout directly.
        net_out_packed = network(net_in_packed, c_noise, cond_mask)

        # kernel 2: EDM post-conditioning + weighted per-sample loss (fused)
        w_col = self.loss_weighting(sigmas).astype(jnp.float32)
        return self.get_loss(x_packed, noise_packed, net_out_packed,
                             sigmas, c_skip, c_out, w_col, d, dp, tile,
                             num_tiles)


# ---- Stand-ins for the externally injected network (glue only) ----

def identity_network(x, c_noise, cond_mask):
    # TODO(synk): real video UNet is external; identity keeps semantics testable.
    return x


def bias_network(x, c_noise, cond_mask):
    # Emits nonzero values into padded lanes too (like real UNet biases),
    # exercising the in-kernel pad mask.
    return x + 0.1


# --------------------------- pure-JAX reference -----------------------------

def reference_loss(loss_mod, network_bias, x, key):
    """Reference of the kerneled path on the true (unpadded) data."""
    b = x.shape[0]
    d = x.shape[1] * x.shape[2] * x.shape[3]
    k_sigma, k_noise, _ = jax.random.split(key, 3)
    sig = jnp.exp(loss_mod.p_mean + loss_mod.p_std
                  * jax.random.normal(k_sigma, (b,), jnp.float32))
    noi = jax.random.normal(k_noise, x.shape, x.dtype)
    sd = loss_mod.sigma_data
    c_skip = sd ** 2 / (sig ** 2 + sd ** 2)
    c_out = sig * sd / jnp.sqrt(sig ** 2 + sd ** 2)
    c_in = 1.0 / jnp.sqrt(sig ** 2 + sd ** 2)
    sig_b = sig.reshape(b, 1, 1, 1)
    noised = x + noi * sig_b
    net_in = c_in.reshape(b, 1, 1, 1) * noised
    net_out = net_in + network_bias
    pred = c_skip.reshape(b, 1, 1, 1) * noised + c_out.reshape(b, 1, 1, 1) * net_out
    w = loss_mod.loss_weighting(sig).reshape(b, 1)
    diff = (pred - x).reshape(b, d)
    if loss_mod.loss_type == "l2":
        err = diff * diff
    else:
        err = jnp.abs(diff)
    return jnp.mean(w * err, axis=1)


# --------------------------------- main ------------------------------------

if __name__ == "__main__":
    key = jax.random.PRNGKey(0)
    k_input, k_fwd, k_input2, k_fwd2 = jax.random.split(key, 4)

    # ---- test 1: spec shape, identity network, l2 and l1, no padding ----
    B, C, H, W = 2, 4, 16, 16
    x = jax.random.normal(k_input, (B, C, H, W), jnp.float32)

    for lt in ("l2", "l1"):
        loss_mod = StandardDiffusionLoss(loss_type=lt,
                                         use_additional_loss=False,
                                         offset_noise_level=0.0,
                                         num_frames=25)
        per_sample_loss = loss_mod(identity_network, x, k_fwd)
        per_sample_loss = jax.block_until_ready(per_sample_loss)
        assert per_sample_loss.shape == (B,)
        assert per_sample_loss.dtype == jnp.float32
        assert bool(jnp.all(jnp.isfinite(per_sample_loss)))
        ref = reference_loss(loss_mod, 0.0, x, k_fwd)
        assert bool(jnp.allclose(per_sample_loss, ref, rtol=1e-5, atol=1e-5)), (
            lt, per_sample_loss, ref)

    # ---- test 2: padded + multi-tile path, bias network (exercises the pad
    #      mask, the t-axis accumulator and the lane-fold peel), small shapes
    #      via an overridden tile cap ----
    B2, C2, H2, W2 = 2, 4, 40, 40
    x2 = jax.random.normal(k_input2, (B2, C2, H2, W2), jnp.float32)
    loss_mod2 = StandardDiffusionLoss(loss_type="l2",
                                      use_additional_loss=False,
                                      offset_noise_level=0.0,
                                      num_frames=25,
                                      max_tile_lanes=384)
    d_pad2, dp2, tile2, nt2 = _tiling(C2 * H2 * W2, 384)
    assert nt2 > 1 and d_pad2 != C2 * H2 * W2   # multi-tile AND padded
    per_sample_loss2 = jax.block_until_ready(loss_mod2(bias_network, x2, k_fwd2))
    assert per_sample_loss2.shape == (B2,)
    assert bool(jnp.all(jnp.isfinite(per_sample_loss2)))
    ref2 = reference_loss(loss_mod2, 0.1, x2, k_fwd2)
    assert bool(jnp.allclose(per_sample_loss2, ref2, rtol=1e-5, atol=1e-5)), (
        per_sample_loss2, ref2)

    print("KERNEL_OK")
</pallas_src>

<mosaic_0001>
module attributes {stable_mosaic.version = 11 : i64} {
  func.func @_net_input_kernel(%arg0: i32, %arg1: i32, %arg2: memref<2x2xf32, #tpu.memory_space<smem>>, %arg3: memref<8x128xf32, #tpu.memory_space<vmem>>, %arg4: memref<8x128xf32, #tpu.memory_space<vmem>>, %arg5: memref<8x128xf32, #tpu.memory_space<vmem>>) attributes {dimension_semantics = [#tpu.dimension_semantics<parallel>, #tpu.dimension_semantics<parallel>], iteration_bounds = array<i64: 2, 1>, scalar_prefetch = 0 : i64, scratch_operands = 0 : i64, tpu.core_type = #tpu.core_type<tc>, window_params = [{transform_indices = @transform_0, window_bounds = array<i64: 2, 2>}, {transform_indices = @transform_1, window_bounds = array<i64: 8, 128>}, {transform_indices = @transform_2, window_bounds = array<i64: 8, 128>}, {transform_indices = @transform_3, window_bounds = array<i64: 8, 128>}]} {
    %c0 = arith.constant 0 : index
    %0 = arith.index_cast %arg0 : i32 to index
    %1 = memref.load %arg2[%c0, %0] : memref<2x2xf32, #tpu.memory_space<smem>>
    %c1 = arith.constant 1 : index
    %2 = arith.index_cast %arg0 : i32 to index
    %3 = memref.load %arg2[%c1, %2] : memref<2x2xf32, #tpu.memory_space<smem>>
    %c0_0 = arith.constant 0 : index
    %c0_1 = arith.constant 0 : index
    %4 = vector.load %arg3[%c0_0, %c0_1] : memref<8x128xf32, #tpu.memory_space<vmem>>, vector<8x128xf32>
    %c0_2 = arith.constant 0 : index
    %c0_3 = arith.constant 0 : index
    %5 = vector.load %arg4[%c0_2, %c0_3] : memref<8x128xf32, #tpu.memory_space<vmem>>, vector<8x128xf32>
    %6 = vector.broadcast %1 : f32 to vector<8x128xf32>
    %7 = arith.mulf %6, %4 : vector<8x128xf32>
    %8 = vector.broadcast %3 : f32 to vector<8x128xf32>
    %9 = arith.mulf %8, %5 : vector<8x128xf32>
    %10 = arith.addf %7, %9 : vector<8x128xf32>
    %c0_4 = arith.constant 0 : index
    %c0_5 = arith.constant 0 : index
    %11 = vector.load %arg5[%c0_4, %c0_5] : memref<8x128xf32, #tpu.memory_space<vmem>>, vector<8x128xf32>
    tpu.vector_store %arg5[%c0_4, %c0_5], %10 {strides = array<i32>} : memref<8x128xf32, #tpu.memory_space<vmem>>, vector<8x128xf32>,
    return
  }
  func.func @transform_0(%arg0: i32, %arg1: i32) -> (i32, i32) {
    %c0_i32 = arith.constant 0 : i32
    %c0_i32_0 = arith.constant 0 : i32
    %c0_i32_1 = arith.constant 0 : i32
    return %c0_i32, %c0_i32_0 : i32, i32
  }
  func.func @transform_1(%arg0: i32, %arg1: i32) -> (i32, i32) {
    %c0_i32 = arith.constant 0 : i32
    return %arg0, %arg1 : i32, i32
  }
  func.func @transform_2(%arg0: i32, %arg1: i32) -> (i32, i32) {
    %c0_i32 = arith.constant 0 : i32
    return %arg0, %arg1 : i32, i32
  }
  func.func @transform_3(%arg0: i32, %arg1: i32) -> (i32, i32) {
    %c0_i32 = arith.constant 0 : i32
    return %arg0, %arg1 : i32, i32
  }
}

</mosaic_0001>

<bundles_post_ra>
// kernel: tpu_custom_call.1
= control target key start
LH: loop header
LB: loop body
LE: loop exit
PB: predicated region body
PF: predicated region fallthrough
CT: control target
= control target key end

     0   :  { %s859_s0 = inlined_call_operand.hbm [shape: f32[2,2], index: 0, kind: input, shape index: {}]   ;;  %s860_s1 = inlined_call_operand.hbm [shape: f32[16,128], index: 1, kind: input, shape index: {}]   ;;  %s861_s2 = inlined_call_operand.hbm [shape: f32[16,128], index: 2, kind: input, shape index: {}]   ;;  %s862_s3 = inlined_call_operand.hbm [shape: f32[16,128], index: 3, kind: output, shape index: {}]  }
   0x1   :  { %864 = sst [smem:[#allocation15_spill]] %s859_s0 }
   0x2   :  { %8 = vsyncpa [#allocation5], 0 }
   0x3   :  { %9 = vsyncpa [#allocation3], 0 }
   0x4   :  { %11 = vsyncpa [#allocation3 + $0x1], 0 }
   0x5   :  { %12 = vsyncpa [#allocation8], 0 }
   0x6   :  { %14 = vsyncpa [#allocation8 + $0x1], 0 }
   0x7   :  { %15 = vsyncpa [#allocation4], 0 }
   0x8   :  { %17 = vsyncpa [#allocation4 + $0x1], 0  ;;  %s698_s12 = smov 0   ;;  %s700_s13 = smov 0  }
   0x9   :  { %s702_s14 = smov 0   ;;  %s704_s15 = smov 0  }
   0xa   :  { %s706_s16 = smov 0   ;;  %s708_s17 = smov 0  }
   0xb LB: > { %s411_s18 = sadd.s32 4294967295, %s675_s17   ;;  %s412_s19 = sadd.s32 4294967294, %s675_s17   ;;  %s675_s17 = sphi %s708_s17, %s23_s17   ;;  %s671_s16 = sphi %s706_s16, %s879_s16   ;;  %s667_s15 = sphi %s704_s15, %s878_s15   ;;  %s663_s14 = sphi %s702_s14, %s877_s14   ;;  %s659_s13 = sphi %s700_s13, %s876_s13   ;;  %s655_s12 = sphi %s698_s12, %s875_s12  }
   0xc   : > { %p78_p0 = scmp.ne.s32.totalorder %s659_s13, %s655_s12  ;;  %p732_p1 = scmp.eq.s32.totalorder %s411_s18, 0 }
   0xd   : > { %p736_p2 = scmp.eq.s32.totalorder %s411_s18, 1  ;;  %p138_p3 = scmp.eq.s32.totalorder %s412_s19, 1 }
   0xe   : > { %p742_p4 = por %p732_p1, %p78_p0  ;;  %p413_p5 = scmp.ge.s32.totalorder %s675_s17, 1 }
   0xf   : > { %p747_p6 = por %p138_p3, %p78_p0  ;;  %p145_p7 = scmp.lt.s32.totalorder %s675_s17, 3 }
  0x10   : > { %s869_s0 = sld [smem:[#allocation15_spill]]  ;;  %s35_s28 = sadd.s32 1, %s671_s16 }
  0x11   : > { %p755_p8 = pnand %p413_p5, %p145_p7  ;;  %s65_s29 = sadd.s32 1, %s663_s14 }
  0x12   : > { %p37_p12 = scmp.ge.s32.totalorder %s35_s28, 2  ;;  %s677_s30 = smov [#allocation2]  }
  0x13   : > { %p442_p10 = pneg %p755_p8  ;;  %p72_p13 = scmp.ne.s32.totalorder %s663_s14, %s659_s13 }
  0x14   : > { %s881_s28 = smov (%p37_p12, %s35_s28), 0  ;;  %p73_p0 = scmp.eq.s32.totalorder %s675_s17, 0 }
  0x15   : > { %p443_p11 = pnand %p442_p10, %p732_p1  ;;  %871 = sst [smem:[#allocation14_spill]] %s881_s28 }
  0x16   : > { %s157_s26 = sshll.u32 %s869_s0, 4  ;;  %s60_s4 = ssub.s32 %s671_s16, %s881_s28  ;;  %s158_s26 = int_to_ptr.hbm [resolvable:$true] %s157_s26 }
  0x17   : > { %445 = dma.hbm_to_smem (!%p443_p11), %s158_s26, 32, %s677_s30, [#allocation5]  }
  0x18   : > { %p458_p3 = scmp.lt.s32.totalorder %s675_s17, 2  ;;  %p63_p5 = scmp.eq.s32.totalorder %s60_s4, 0 }
  0x19   : > { %p74_p7 = por %p73_p0, %p72_p13  ;;  %p776_p9 = por %p736_p2, %p72_p13 }
  0x1a   : > { %s168_s6 = sand.u32 1, %s663_s14   ;;  %s417_s9 = sshll.u32 %s671_s16, 3 }
  0x1b   : > { %s782_s7 = scalar_select %p63_p5, %s663_s14, %s65_s29  }
  0x1c   : > { %s416_s8 = sshll.u32 %s168_s6, 3  ;;  %s177_s18 = scalar_lea.hbm %s860_s1, %s417_s9 }
  0x1d   : > { %s172_s19 = scalar_lea.vmem [#allocation6], %s416_s8  ;;  %s179_s25 = sshll.u32 %s177_s18, 4  ;;  %s180_s25 = int_to_ptr.hbm [resolvable:$true] %s179_s25 }
  0x1e   : > { %s181_s24 = sshll.u32 %s172_s19, 4  ;;  %p447_p10 = pnand %p458_p3, %p74_p7  ;;  %s182_s24 = int_to_ptr.vmem [resolvable:$true] %s181_s24 }
  0x1f   : > { %s197_s30 = scalar_lea.hbm %s861_s2, %s417_s9  ;;  %s169_s4 = scalar_lea.sflag [#allocation3], %s168_s6 }
  0x20   : > { %449 = dma.hbm_to_vmem [thread:$0]  (!%p447_p10), %s180_s25, 128, %s182_s24, %s169_s4  }
  0x21   : > { %s199_s29 = sshll.u32 %s197_s30, 4  ;;  %s192_s0 = scalar_lea.vmem [#allocation7], %s416_s8  ;;  %s200_s29 = int_to_ptr.hbm [resolvable:$true] %s199_s29 }
  0x22   : > { %s201_s28 = sshll.u32 %s192_s0, 4  ;;  %s189_s10 = scalar_lea.sflag [#allocation8], %s168_s6  ;;  %s202_s28 = int_to_ptr.vmem [resolvable:$true] %s201_s28 }
  0x23   : > { %452 = dma.hbm_to_vmem [thread:$0]  (!%p447_p10), %s200_s29, 128, %s202_s28, %s189_s10  }
  0x24   : > { %210 = sbr.rel (%p755_p8) target bundleno = 68 (0x44), region = 32 }
  0x29   : > { %638 = dma.done.wait (%p732_p1), [#allocation5], 32  }
  0x2a   : > { %640 = vsyncadd (%p732_p1), [#allocation5], 4294967264  ;;  %s800_s9 = sand.u32 1, %s659_s13  }
  0x2b   : > { %s803_s0 = sshll.u32 %s800_s9, 3  ;;  %s218_s6 = scalar_lea.sflag [#allocation3], %s800_s9 }
  0x2c   : > { %s221_s28 = scalar_lea.vmem [#allocation6], %s803_s0 }
  0x2d   : > { %642 = dma.done.wait (%p742_p4), %s218_s6, 128  }
  0x2e   : > { %644 = vsyncadd (%p742_p4), %s218_s6, 4294967168  ;;  %s228_s20 = scalar_lea.sflag [#allocation8], %s800_s9  ;;  %s231_s27 = scalar_lea.vmem [#allocation7], %s803_s0 }
  0x2f   : > { %646 = dma.done.wait (%p742_p4), %s228_s20, 128  }
  0x30   : > { %648 = vsyncadd (%p742_p4), %s228_s20, 4294967168 }
  0x31   : > { %237 = sfence }
  0x32   : > { %s261_s8 = sld [smem:[#allocation2 + %s667_s15]]  ;;  %s262_s11 = sshra.s32 %s667_s15, 7  ;;  %v270_v0 = vld [vmem:[%s221_s28] sm:$0xff]  ;;  %v271_v2 = vld [vmem:[%s231_s27] sm:$0xff] }
  0x33   : > { %s267_s18 = sand.u32 127, %s667_s15  ;;  %s430_s19 = sshll.u32 %s262_s11, 7 }
  0x34   : > { %s431_s24 = sadd.s32 128, %s430_s19  ;;  %s427_s26 = sshll.u32 %s667_s15, 3 }
  0x35   : > { %s268_s25 = sadd.s32 %s431_s24, %s267_s18  ;;  %s290_s4 = scalar_lea.hbm %s862_s3, %s427_s26 }
  0x36   : > { %s269_s21 = sld [smem:[#allocation2 + %s268_s25]]  ;;  %s260_s29 = scalar_lea.vmem [#allocation9], %s803_s0 }
  0x37   : > { %s292_s10 = sshll.u32 %s260_s29, 4  ;;  %s294_s6 = sshll.u32 %s290_s4, 4  ;;  %s293_s10 = int_to_ptr.vmem [resolvable:$true] %s292_s10  ;;  %s295_s6 = int_to_ptr.hbm [resolvable:$true] %s294_s6 }
  0x38   : > { %v272_v1 = vstv %s261_s8  ;;  %s279_s20 = scalar_lea.sflag [#allocation4], %s800_s9  ;;  %s599_s15 = sshra.s32 %s295_s6, 4  ;;  %s600_s15 = int_to_ptr.hbm [resolvable:$true] %s599_s15 }
  0x39   : > { %v273_v3 = vmul.f32 %v272_v1, %v270_v0  ;;  %s601_s28 = scalar_lea.hbm %s600_s15, 8  ;;  %s605_s0 = scalar_lea.hbm %s862_s3, 16 }
  0x3a   : > { %p602_p1 = scmp.ne.s32.totalorder %s600_s15, %s601_s28  ;;  %p606_p8 = scmp.lt.s32.totalorder %s600_s15, %s862_s3 }
  0x3b   : > { %p607_p11 = scmp.lt.s32.totalorder %s605_s0, %s601_s28 }
  0x3c   : > { %v274_v4 = vstv %s269_s21  ;;  %p603_p2 = pnand %p602_p1, %p776_p9 }
  0x3d   : > { %v275_v5 = vmul.f32 %v274_v4, %v271_v2  ;;  %p608_p12 = por %p607_p11, %p606_p8 }
  0x3e   : > { %p604_p4 = pneg %p603_p2 }
  0x3f   : > { %v276_v6 = vadd.f32 %v275_v5, %v273_v3 }
  0x40   : > { %p609_p13 = pnand %p608_p12, %p604_p4 }
  0x41   : > { %277 = vst [vmem:[%s260_s29] sm:$0xff] %v276_v6 }
  0x42   : > { %612 = shalt.err (!%p609_p13)
}
  0x43   : > { %440 = dma.vmem_to_hbm [thread:$0]  (%p776_p9), %s293_s10, 128, %s295_s6, %s279_s20  }
  0x44 PF: > { %s306_s9 = sand.u32 1, %s655_s12   ;;  %p873_p0 = scmp.ge.s32.totalorder %s675_s17, 2 }
  0x45   : > { %s307_s19 = scalar_lea.sflag [#allocation4], %s306_s9 }
  0x46   : > { %p454_p3 = pnand %p873_p0, %p747_p6 }
  0x48   : > { %p455_p5 = pneg %p454_p3 }
  0x4a   : > { %650 = dma.done.wait (%p455_p5), %s307_s19, 128  }
  0x4b   : > { %652 = vsyncadd (%p455_p5), %s307_s19, 4294967168  ;;  %s23_s17 = sadd.s32 1, %s675_s17   ;;  %s874_s5 = sld [smem:[#allocation14_spill]] }
  0x4c   : > { %p20_p7 = scmp.ge.s32.totalorder %s23_s17, 4   ;;  %s875_s12 = smov %s659_s13 }
  0x4d   : > { %s876_s13 = smov %s663_s14  ;;  %s877_s14 = smov %s782_s7 }
  0x4e   : > { %s878_s15 = smov %s671_s16  ;;  %22 = sbr.rel (!%p20_p7) target bundleno = 11 (0xb), region = 95 }
  0x51   : > { %s879_s16 = smov %s874_s5 }
  0x53   :  { %313 = vsyncpa [#allocation3], 1 }
  0x54   :  { %315 = vsyncpa [#allocation3 + $0x1], 1 }
  0x55   :  { %316 = vsyncpa [#allocation8], 1 }
  0x56   :  { %318 = vsyncpa [#allocation8 + $0x1], 1 }
  0x57   :  { %319 = vsyncpa [#allocation4], 1 }
  0x58   :  { %321 = vsyncpa [#allocation4 + $0x1], 1 }
  0x59   :  { %322 = vsyncpa [#allocation5], 1 }
  0x5a   :  { %324 = vsyncpa [#allocation5 + $0x1], 1 }

</bundles_post_ra>
